<compile_context>
chip_gen: v5e
topology: v5e:2x2
jax: 0.10.0
libtpu: 0.0.40
codegen_flags: <defaults>
</compile_context>

<pallas_src>
import functools

import jax
import jax.numpy as jnp
from jax.experimental import pallas as pl
from jax.experimental.pallas import tpu as pltpu


# ----------------------------- Pallas kernel --------------------------------
def _residual_block_kernel(x_ref, w1_ref, w2_ref,
                           g1_ref, be1_ref, g2_ref, be2_ref,
                           out_ref, *, height, width, channels, k_size,
                           compute_dtype):
    """Whole residual block on one VMEM-resident, lane-dense block.

    x_ref      : (N*H, W*C) f32   rows = n*H + h, lanes = w*C + c
    w1/w2_ref  : (K, W*C, W*C)    banded conv weight slabs (one per H tap;
                                  W taps + W-direction zero padding inside)
    g*/be*_ref : (1, W*C)   f32   BN gamma/beta tiled over the w lane-groups
    out_ref    : (N*H, W*C) f32
    """
    NH, WC = x_ref.shape
    K = k_size
    P = K // 2
    C = channels
    inv_count = 1.0 / float(NH * width)        # 1 / (N*H*W) for BN stats
    EPS = 1e-5

    x = x_ref[...]                             # (NH, WC) f32

    # Boundary masks for the non-center H taps: zero the rows whose shifted
    # source falls outside the same image (the H-direction zero padding).
    # Pure VPU work, computed once, reused by both convs.
    h_idx = jax.lax.broadcasted_iota(jnp.int32, (NH, WC), 0) % height
    pad_masks = {}
    for dh in range(-P, P + 1):
        if dh == 0:
            continue
        pad_masks[dh] = ((h_idx + dh >= 0) &
                         (h_idx + dh < height)).astype(jnp.float32)

    def conv(y, w_ref):
        # K taps along H: XLU sublane roll + VPU boundary mask per tap, then
        # one (NH,WC)x(WC,WC) MXU matmul per tap, accumulated in f32.  The W
        # taps and the W-direction zero padding live inside the banded slabs.
        acc = None
        for i in range(K):
            dh = i - P
            if dh == 0:
                tap = y
            else:
                # roll(y, s)[r] = y[(r - s) mod NH]  =>  s = (-dh) mod NH
                tap = pltpu.roll(y, shift=(-dh) % NH, axis=0) * pad_masks[dh]
            part = jnp.dot(tap.astype(compute_dtype), w_ref[i],
                           preferred_element_type=jnp.float32)   # f32 acc
            acc = part if acc is None else acc + part
        return acc                                               # (NH, WC) f32

    def batch_norm(y, gamma, beta):
        # One-pass stats (sum, sum of squares); per-channel all-reduce across
        # the W lane groups via a log2(W)-step cyclic lane roll-reduce (XLU),
        # which also broadcasts the result back to every lane.  No MXU pushes.
        s1 = jnp.sum(y, axis=0, keepdims=True)                   # (1, WC)
        s2 = jnp.sum(y * y, axis=0, keepdims=True)               # (1, WC)
        step = C
        while step < WC:
            s1 = s1 + pltpu.roll(s1, shift=step, axis=1)
            s2 = s2 + pltpu.roll(s2, shift=step, axis=1)
            step *= 2
        mean = s1 * inv_count
        var = s2 * inv_count - mean * mean                       # biased var
        inv_std = jax.lax.rsqrt(var + EPS)                       # EUP
        return (y - mean) * (inv_std * gamma) + beta

    y = conv(x, w1_ref)                        # conv1 (bias cancelled by BN)
    y = batch_norm(y, g1_ref[...], be1_ref[...])
    y = jnp.maximum(y, 0.0)                    # ReLU
    y = conv(y, w2_ref)                        # conv2 (bias cancelled by BN)
    y = batch_norm(y, g2_ref[...], be2_ref[...])

    out_ref[...] = (x + y).astype(out_ref.dtype)                 # residual add


# --------------------------- wrapper-side packing ----------------------------
def _banded_weights(w_oihw, width, channels, k_size, dtype):
    """OIHW conv weights -> (K, W*C, W*C) banded slabs for lane-dense matmuls.

    Slab kh, row = w_in*C + c_in, col = w_out*C + c_out,
    entry = w[c_out, c_in, kh, w_in - w_out + P]; zero outside the band, which
    also realizes the width-direction zero padding of the convolution.
    """
    K, P, W, C = k_size, k_size // 2, width, channels
    w_hwio = jnp.transpose(w_oihw, (2, 3, 1, 0)).astype(jnp.float32)  # (K,K,Ci,Co)
    wi = jnp.arange(W)[:, None]
    wo = jnp.arange(W)[None, :]
    kw = wi - wo + P                                           # (W, W)
    valid = (kw >= 0) & (kw < K)
    taps = w_hwio[:, jnp.clip(kw, 0, K - 1)]                   # (K, Wi, Wo, Ci, Co)
    taps = jnp.where(valid[None, :, :, None, None], taps, 0.0)
    wb = jnp.transpose(taps, (0, 1, 3, 2, 4)).reshape(K, W * C, W * C)
    return wb.astype(dtype)


@functools.partial(jax.jit, static_argnames=("k_size", "compute_dtype"))
def residual_block(x_nchw, params, *, k_size, compute_dtype=jnp.float32):
    """x_nchw: (N, C, H, W) float32, PyTorch layout. Returns (N, C, H, W)."""
    N, C, H, W = x_nchw.shape
    K = k_size
    NH, WC = N * H, W * C
    # Lane/sublane-dense packing requirement of this single-block kernel.
    assert WC % 128 == 0 and NH % 8 == 0, "need W*C % 128 == 0 and N*H % 8 == 0"
    assert W & (W - 1) == 0, "BN lane roll-reduce needs power-of-two W"
    # TODO(synk): stride s > 1 is unsupported (residual add shape mismatch,
    # exactly as in the PyTorch module); only s == 1 is implemented.
    # TODO(synk): at production sizes (esp. v7x: 64 MiB VMEM, 2 TensorCores)
    # grid over N*H row tiles (halo handled by the same rolls/masks or an
    # overlapping index_map), dimension_semantics=("parallel",...), constant
    # index_maps for the weight/gamma/beta BlockSpecs, and a grid-accumulated
    # two-phase BatchNorm; the batch-global BN statistics make that a
    # multi-phase design, and at this toy size the whole block fits in one
    # VMEM-resident grid point (~0.5 MiB).
    # TODO(synk): for C >= 128 drop the W-in-lanes banded packing and use a
    # dense (K*K*C, C) im2col weight (C alone on lanes) to remove the
    # ~(1 - K/W) structural-zero MACs; for small C the band keeps lanes dense.
    # TODO(synk): when chaining residual blocks, keep activations in this
    # lane-dense (N*H, W*C) layout between blocks — the NCHW<->lane-dense
    # transposes below are whole-array HBM round-trips per call.

    # NCHW -> lane-dense (N*H, W*C): rows n*H + h, lanes w*C + c.
    x2d = jnp.transpose(x_nchw, (0, 2, 3, 1)).reshape(NH, WC)

    # Banded conv weights in the MXU operand dtype (conv biases are dropped:
    # they are exactly cancelled by training-mode BN's mean subtraction).
    w1b = _banded_weights(params["w1"], W, C, K, compute_dtype)   # (K, WC, WC)
    w2b = _banded_weights(params["w2"], W, C, K, compute_dtype)

    tile = lambda v: jnp.tile(v.astype(jnp.float32), W).reshape(1, WC)
    g1, be1 = tile(params["gamma1"]), tile(params["beta1"])
    g2, be2 = tile(params["gamma2"]), tile(params["beta2"])

    itemsize = jnp.dtype(compute_dtype).itemsize
    cost = pl.CostEstimate(
        flops=2 * 2 * NH * (K * WC) * WC,            # two convs, K taps each
        transcendentals=2 * WC,                       # two BN rsqrt rows
        bytes_accessed=2 * NH * WC * 4 + 2 * K * WC * WC * itemsize + 4 * WC * 4,
    )

    vmem = pl.BlockSpec(memory_space=pltpu.MemorySpace.VMEM)
    kernel = functools.partial(_residual_block_kernel, height=H, width=W,
                               channels=C, k_size=K, compute_dtype=compute_dtype)
    out2d = pl.pallas_call(
        kernel,
        out_shape=jax.ShapeDtypeStruct((NH, WC), x2d.dtype),
        in_specs=[vmem] * 7,
        out_specs=vmem,
        cost_estimate=cost,
        compiler_params=pltpu.CompilerParams(vmem_limit_bytes=32 * 1024 * 1024),
    )(x2d, w1b, w2b, g1, be1, g2, be2)

    return jnp.transpose(out2d.reshape(N, H, W, C), (0, 3, 1, 2))


# ------------------------- pure-JAX reference -------------------------------
def _reference(x, params, k_size):
    P = k_size // 2
    eps = 1e-5

    def conv(x, w, b):
        y = jax.lax.conv_general_dilated(
            x, w, window_strides=(1, 1), padding=[(P, P), (P, P)],
            dimension_numbers=("NCHW", "OIHW", "NCHW"))
        return y + b.reshape(1, -1, 1, 1)

    def bn(y, g, be):
        mean = y.mean(axis=(0, 2, 3), keepdims=True)
        var = ((y - mean) ** 2).mean(axis=(0, 2, 3), keepdims=True)
        return (y - mean) / jnp.sqrt(var + eps) * g.reshape(1, -1, 1, 1) \
            + be.reshape(1, -1, 1, 1)

    y = conv(x, params["w1"], params["b1"])
    y = jnp.maximum(bn(y, params["gamma1"], params["beta1"]), 0.0)
    y = conv(y, params["w2"], params["b2"])
    y = bn(y, params["gamma2"], params["beta2"])
    return x + y


# ------------------------------- main ----------------------------------------
if __name__ == "__main__":
    # n_channels=8, k_size=3, s=1, 16x16 spatial -> W*C = 128 (lane-dense),
    # N*H = 32 (sublane-aligned).
    N, C, H, W, K = 2, 8, 16, 16, 3

    key = jax.random.PRNGKey(0)
    kx, kw1, kb1, kw2, kb2 = jax.random.split(key, 5)

    x = jax.random.normal(kx, (N, C, H, W), jnp.float32)

    fan_in = C * K * K
    bound = 1.0 / (fan_in ** 0.5)
    params = {
        "w1": jax.random.uniform(kw1, (C, C, K, K), jnp.float32, -bound, bound),
        "b1": jax.random.uniform(kb1, (C,), jnp.float32, -bound, bound),
        "w2": jax.random.uniform(kw2, (C, C, K, K), jnp.float32, -bound, bound),
        "b2": jax.random.uniform(kb2, (C,), jnp.float32, -bound, bound),
        "gamma1": jnp.ones((C,), jnp.float32),
        "beta1": jnp.zeros((C,), jnp.float32),
        "gamma2": jnp.ones((C,), jnp.float32),
        "beta2": jnp.zeros((C,), jnp.float32),
    }

    ref = jax.block_until_ready(_reference(x, params, K))

    # f32-operand path: tight functional check against the XLA reference.
    out = jax.block_until_ready(residual_block(x, params, k_size=K))
    assert out.shape == (N, C, H, W)
    assert jnp.allclose(out, ref, atol=1e-3, rtol=1e-3), (
        float(jnp.max(jnp.abs(out - ref))))

    # bf16 MXU-operand path (f32 accumulation, f32 BN stats/elementwise);
    # looser tolerance only reflects the bf16 operand rounding.
    out_bf16 = jax.block_until_ready(
        residual_block(x, params, k_size=K, compute_dtype=jnp.bfloat16))
    assert jnp.allclose(out_bf16, ref, atol=1e-1, rtol=1e-1), (
        float(jnp.max(jnp.abs(out_bf16 - ref))))

    print("KERNEL_OK")
</pallas_src>

<mosaic_0001>
module attributes {stable_mosaic.version = 11 : i64} {
  func.func @_residual_block_kernel(%arg0: memref<32x128xf32, #tpu.memory_space<vmem>>, %arg1: memref<3x128x128xf32, #tpu.memory_space<vmem>>, %arg2: memref<3x128x128xf32, #tpu.memory_space<vmem>>, %arg3: memref<1x128xf32, #tpu.memory_space<vmem>>, %arg4: memref<1x128xf32, #tpu.memory_space<vmem>>, %arg5: memref<1x128xf32, #tpu.memory_space<vmem>>, %arg6: memref<1x128xf32, #tpu.memory_space<vmem>>, %arg7: memref<32x128xf32, #tpu.memory_space<vmem>>) attributes {dimension_semantics = [], scalar_prefetch = 0 : i64, scratch_operands = 0 : i64, tpu.core_type = #tpu.core_type<tc>} {
    %c0 = arith.constant 0 : index
    %c0_0 = arith.constant 0 : index
    %0 = vector.load %arg0[%c0, %c0_0] : memref<32x128xf32, #tpu.memory_space<vmem>>, vector<32x128xf32>
    %1 = tpu.iota {dimensions = array<i32: 0>} : vector<32x128xi32>
    %c16_i32 = arith.constant 16 : i32
    %c0_i32 = arith.constant 0 : i32
    %2 = arith.cmpi eq, %c16_i32, %c0_i32 : i32
    %c1_i32 = arith.constant 1 : i32
    %3 = arith.select %2, %c1_i32, %c16_i32 : i32
    %4 = vector.broadcast %3 : i32 to vector<32x128xi32>
    %5 = arith.remsi %1, %4 : vector<32x128xi32>
    %c0_i32_1 = arith.constant 0 : i32
    %6 = vector.broadcast %c0_i32_1 : i32 to vector<32x128xi32>
    %7 = arith.cmpi ne, %5, %6 : vector<32x128xi32>
    %c0_i32_2 = arith.constant 0 : i32
    %8 = vector.broadcast %c0_i32_2 : i32 to vector<32x128xi32>
    %9 = arith.cmpi slt, %5, %8 : vector<32x128xi32>
    %c0_i32_3 = arith.constant 0 : i32
    %10 = arith.cmpi slt, %3, %c0_i32_3 : i32
    %11 = vector.broadcast %10 : i1 to vector<32x128xi1>
    %12 = vector.broadcast %11 : vector<32x128xi1> to vector<32x128xi1>
    %13 = arith.xori %9, %12 : vector<32x128xi1>
    %14 = arith.andi %13, %7 : vector<32x128xi1>
    %15 = vector.broadcast %3 : i32 to vector<32x128xi32>
    %16 = arith.addi %5, %15 : vector<32x128xi32>
    %17 = arith.select %14, %16, %5 : vector<32x128xi1>, vector<32x128xi32>
    %c-1_i32 = arith.constant -1 : i32
    %18 = vector.broadcast %c-1_i32 : i32 to vector<32x128xi32>
    %19 = arith.addi %17, %18 : vector<32x128xi32>
    %c0_i32_4 = arith.constant 0 : i32
    %20 = vector.broadcast %c0_i32_4 : i32 to vector<32x128xi32>
    %21 = arith.cmpi sge, %19, %20 : vector<32x128xi32>
    %c-1_i32_5 = arith.constant -1 : i32
    %22 = vector.broadcast %c-1_i32_5 : i32 to vector<32x128xi32>
    %23 = arith.addi %17, %22 : vector<32x128xi32>
    %c16_i32_6 = arith.constant 16 : i32
    %24 = vector.broadcast %c16_i32_6 : i32 to vector<32x128xi32>
    %25 = arith.cmpi slt, %23, %24 : vector<32x128xi32>
    %26 = arith.andi %21, %25 : vector<32x128xi1>
    %27 = arith.extui %26 : vector<32x128xi1> to vector<32x128xi32>
    %28 = arith.sitofp %27 : vector<32x128xi32> to vector<32x128xf32>
    %c1_i32_7 = arith.constant 1 : i32
    %29 = vector.broadcast %c1_i32_7 : i32 to vector<32x128xi32>
    %30 = arith.addi %17, %29 : vector<32x128xi32>
    %c0_i32_8 = arith.constant 0 : i32
    %31 = vector.broadcast %c0_i32_8 : i32 to vector<32x128xi32>
    %32 = arith.cmpi sge, %30, %31 : vector<32x128xi32>
    %c1_i32_9 = arith.constant 1 : i32
    %33 = vector.broadcast %c1_i32_9 : i32 to vector<32x128xi32>
    %34 = arith.addi %17, %33 : vector<32x128xi32>
    %c16_i32_10 = arith.constant 16 : i32
    %35 = vector.broadcast %c16_i32_10 : i32 to vector<32x128xi32>
    %36 = arith.cmpi slt, %34, %35 : vector<32x128xi32>
    %37 = arith.andi %32, %36 : vector<32x128xi1>
    %38 = arith.extui %37 : vector<32x128xi1> to vector<32x128xi32>
    %39 = arith.sitofp %38 : vector<32x128xi32> to vector<32x128xf32>
    %c1_i32_11 = arith.constant 1 : i32
    %40 = tpu.dynamic_rotate %0 by %c1_i32_11 dim 0 : vector<32x128xf32>, i32 -> vector<32x128xf32>
    %41 = arith.mulf %40, %28 : vector<32x128xf32>
    %c0_12 = arith.constant 0 : index
    %c0_13 = arith.constant 0 : index
    %c0_14 = arith.constant 0 : index
    %42 = vector.load %arg1[%c0_12, %c0_13, %c0_14] : memref<3x128x128xf32, #tpu.memory_space<vmem>>, vector<1x128x128xf32>
    %43 = vector.shape_cast %42 : vector<1x128x128xf32> to vector<128x128xf32>
    %cst = arith.constant dense<0.000000e+00> : vector<32x128xf32>
    %44 = tpu.matmul %41, %43, %cst {dimension_numbers = #tpu.dot_dimension_numbers<[1], [0], [0], [1], [0, 0, 1, 1], [], []>} : vector<32x128xf32>, vector<128x128xf32>, vector<32x128xf32> -> vector<32x128xf32>
    %c1 = arith.constant 1 : index
    %c0_15 = arith.constant 0 : index
    %c0_16 = arith.constant 0 : index
    %45 = vector.load %arg1[%c1, %c0_15, %c0_16] : memref<3x128x128xf32, #tpu.memory_space<vmem>>, vector<1x128x128xf32>
    %46 = vector.shape_cast %45 : vector<1x128x128xf32> to vector<128x128xf32>
    %cst_17 = arith.constant dense<0.000000e+00> : vector<32x128xf32>
    %47 = tpu.matmul %0, %46, %cst_17 {dimension_numbers = #tpu.dot_dimension_numbers<[1], [0], [0], [1], [0, 0, 1, 1], [], []>} : vector<32x128xf32>, vector<128x128xf32>, vector<32x128xf32> -> vector<32x128xf32>
    %48 = arith.addf %44, %47 : vector<32x128xf32>
    %c31_i32 = arith.constant 31 : i32
    %49 = tpu.dynamic_rotate %0 by %c31_i32 dim 0 : vector<32x128xf32>, i32 -> vector<32x128xf32>
    %50 = arith.mulf %49, %39 : vector<32x128xf32>
    %c2 = arith.constant 2 : index
    %c0_18 = arith.constant 0 : index
    %c0_19 = arith.constant 0 : index
    %51 = vector.load %arg1[%c2, %c0_18, %c0_19] : memref<3x128x128xf32, #tpu.memory_space<vmem>>, vector<1x128x128xf32>
    %52 = vector.shape_cast %51 : vector<1x128x128xf32> to vector<128x128xf32>
    %cst_20 = arith.constant dense<0.000000e+00> : vector<32x128xf32>
    %53 = tpu.matmul %50, %52, %cst_20 {dimension_numbers = #tpu.dot_dimension_numbers<[1], [0], [0], [1], [0, 0, 1, 1], [], []>} : vector<32x128xf32>, vector<128x128xf32>, vector<32x128xf32> -> vector<32x128xf32>
    %54 = arith.addf %48, %53 : vector<32x128xf32>
    %c0_21 = arith.constant 0 : index
    %c0_22 = arith.constant 0 : index
    %55 = vector.load %arg3[%c0_21, %c0_22] : memref<1x128xf32, #tpu.memory_space<vmem>>, vector<1x128xf32>
    %c0_23 = arith.constant 0 : index
    %c0_24 = arith.constant 0 : index
    %56 = vector.load %arg4[%c0_23, %c0_24] : memref<1x128xf32, #tpu.memory_space<vmem>>, vector<1x128xf32>
    %cst_25 = arith.constant dense<0.000000e+00> : vector<128xf32>
    %57 = vector.multi_reduction <add>, %54, %cst_25 [0] : vector<32x128xf32> to vector<128xf32>
    %58 = vector.shape_cast %57 : vector<128xf32> to vector<1x128xf32>
    %59 = arith.mulf %54, %54 : vector<32x128xf32>
    %cst_26 = arith.constant dense<0.000000e+00> : vector<128xf32>
    %60 = vector.multi_reduction <add>, %59, %cst_26 [0] : vector<32x128xf32> to vector<128xf32>
    %61 = vector.shape_cast %60 : vector<128xf32> to vector<1x128xf32>
    %c8_i32 = arith.constant 8 : i32
    %62 = tpu.dynamic_rotate %58 by %c8_i32 dim 1 : vector<1x128xf32>, i32 -> vector<1x128xf32>
    %63 = arith.addf %58, %62 : vector<1x128xf32>
    %c8_i32_27 = arith.constant 8 : i32
    %64 = tpu.dynamic_rotate %61 by %c8_i32_27 dim 1 : vector<1x128xf32>, i32 -> vector<1x128xf32>
    %65 = arith.addf %61, %64 : vector<1x128xf32>
    %c16_i32_28 = arith.constant 16 : i32
    %66 = tpu.dynamic_rotate %63 by %c16_i32_28 dim 1 : vector<1x128xf32>, i32 -> vector<1x128xf32>
    %67 = arith.addf %63, %66 : vector<1x128xf32>
    %c16_i32_29 = arith.constant 16 : i32
    %68 = tpu.dynamic_rotate %65 by %c16_i32_29 dim 1 : vector<1x128xf32>, i32 -> vector<1x128xf32>
    %69 = arith.addf %65, %68 : vector<1x128xf32>
    %c32_i32 = arith.constant 32 : i32
    %70 = tpu.dynamic_rotate %67 by %c32_i32 dim 1 : vector<1x128xf32>, i32 -> vector<1x128xf32>
    %71 = arith.addf %67, %70 : vector<1x128xf32>
    %c32_i32_30 = arith.constant 32 : i32
    %72 = tpu.dynamic_rotate %69 by %c32_i32_30 dim 1 : vector<1x128xf32>, i32 -> vector<1x128xf32>
    %73 = arith.addf %69, %72 : vector<1x128xf32>
    %c64_i32 = arith.constant 64 : i32
    %74 = tpu.dynamic_rotate %71 by %c64_i32 dim 1 : vector<1x128xf32>, i32 -> vector<1x128xf32>
    %75 = arith.addf %71, %74 : vector<1x128xf32>
    %c64_i32_31 = arith.constant 64 : i32
    %76 = tpu.dynamic_rotate %73 by %c64_i32_31 dim 1 : vector<1x128xf32>, i32 -> vector<1x128xf32>
    %77 = arith.addf %73, %76 : vector<1x128xf32>
    %cst_32 = arith.constant 0.001953125 : f32
    %78 = vector.broadcast %cst_32 : f32 to vector<1x128xf32>
    %79 = arith.mulf %75, %78 : vector<1x128xf32>
    %cst_33 = arith.constant 0.001953125 : f32
    %80 = vector.broadcast %cst_33 : f32 to vector<1x128xf32>
    %81 = arith.mulf %77, %80 : vector<1x128xf32>
    %82 = arith.mulf %79, %79 : vector<1x128xf32>
    %83 = arith.subf %81, %82 : vector<1x128xf32>
    %cst_34 = arith.constant 9.99999974E-6 : f32
    %84 = vector.broadcast %cst_34 : f32 to vector<1x128xf32>
    %85 = arith.addf %83, %84 : vector<1x128xf32>
    %86 = math.rsqrt %85 : vector<1x128xf32>
    %87 = vector.broadcast %79 : vector<1x128xf32> to vector<32x128xf32>
    %88 = arith.subf %54, %87 : vector<32x128xf32>
    %89 = arith.mulf %86, %55 : vector<1x128xf32>
    %90 = vector.broadcast %89 : vector<1x128xf32> to vector<32x128xf32>
    %91 = arith.mulf %88, %90 : vector<32x128xf32>
    %92 = vector.broadcast %56 : vector<1x128xf32> to vector<32x128xf32>
    %93 = arith.addf %91, %92 : vector<32x128xf32>
    %cst_35 = arith.constant 0.000000e+00 : f32
    %94 = vector.broadcast %cst_35 : f32 to vector<32x128xf32>
    %95 = arith.maximumf %93, %94 : vector<32x128xf32>
    %c1_i32_36 = arith.constant 1 : i32
    %96 = tpu.dynamic_rotate %95 by %c1_i32_36 dim 0 : vector<32x128xf32>, i32 -> vector<32x128xf32>
    %97 = arith.mulf %96, %28 : vector<32x128xf32>
    %c0_37 = arith.constant 0 : index
    %c0_38 = arith.constant 0 : index
    %c0_39 = arith.constant 0 : index
    %98 = vector.load %arg2[%c0_37, %c0_38, %c0_39] : memref<3x128x128xf32, #tpu.memory_space<vmem>>, vector<1x128x128xf32>
    %99 = vector.shape_cast %98 : vector<1x128x128xf32> to vector<128x128xf32>
    %cst_40 = arith.constant dense<0.000000e+00> : vector<32x128xf32>
    %100 = tpu.matmul %97, %99, %cst_40 {dimension_numbers = #tpu.dot_dimension_numbers<[1], [0], [0], [1], [0, 0, 1, 1], [], []>} : vector<32x128xf32>, vector<128x128xf32>, vector<32x128xf32> -> vector<32x128xf32>
    %c1_41 = arith.constant 1 : index
    %c0_42 = arith.constant 0 : index
    %c0_43 = arith.constant 0 : index
    %101 = vector.load %arg2[%c1_41, %c0_42, %c0_43] : memref<3x128x128xf32, #tpu.memory_space<vmem>>, vector<1x128x128xf32>
    %102 = vector.shape_cast %101 : vector<1x128x128xf32> to vector<128x128xf32>
    %cst_44 = arith.constant dense<0.000000e+00> : vector<32x128xf32>
    %103 = tpu.matmul %95, %102, %cst_44 {dimension_numbers = #tpu.dot_dimension_numbers<[1], [0], [0], [1], [0, 0, 1, 1], [], []>} : vector<32x128xf32>, vector<128x128xf32>, vector<32x128xf32> -> vector<32x128xf32>
    %104 = arith.addf %100, %103 : vector<32x128xf32>
    %c31_i32_45 = arith.constant 31 : i32
    %105 = tpu.dynamic_rotate %95 by %c31_i32_45 dim 0 : vector<32x128xf32>, i32 -> vector<32x128xf32>
    %106 = arith.mulf %105, %39 : vector<32x128xf32>
    %c2_46 = arith.constant 2 : index
    %c0_47 = arith.constant 0 : index
    %c0_48 = arith.constant 0 : index
    %107 = vector.load %arg2[%c2_46, %c0_47, %c0_48] : memref<3x128x128xf32, #tpu.memory_space<vmem>>, vector<1x128x128xf32>
    %108 = vector.shape_cast %107 : vector<1x128x128xf32> to vector<128x128xf32>
    %cst_49 = arith.constant dense<0.000000e+00> : vector<32x128xf32>
    %109 = tpu.matmul %106, %108, %cst_49 {dimension_numbers = #tpu.dot_dimension_numbers<[1], [0], [0], [1], [0, 0, 1, 1], [], []>} : vector<32x128xf32>, vector<128x128xf32>, vector<32x128xf32> -> vector<32x128xf32>
    %110 = arith.addf %104, %109 : vector<32x128xf32>
    %c0_50 = arith.constant 0 : index
    %c0_51 = arith.constant 0 : index
    %111 = vector.load %arg5[%c0_50, %c0_51] : memref<1x128xf32, #tpu.memory_space<vmem>>, vector<1x128xf32>
    %c0_52 = arith.constant 0 : index
    %c0_53 = arith.constant 0 : index
    %112 = vector.load %arg6[%c0_52, %c0_53] : memref<1x128xf32, #tpu.memory_space<vmem>>, vector<1x128xf32>
    %cst_54 = arith.constant dense<0.000000e+00> : vector<128xf32>
    %113 = vector.multi_reduction <add>, %110, %cst_54 [0] : vector<32x128xf32> to vector<128xf32>
    %114 = vector.shape_cast %113 : vector<128xf32> to vector<1x128xf32>
    %115 = arith.mulf %110, %110 : vector<32x128xf32>
    %cst_55 = arith.constant dense<0.000000e+00> : vector<128xf32>
    %116 = vector.multi_reduction <add>, %115, %cst_55 [0] : vector<32x128xf32> to vector<128xf32>
    %117 = vector.shape_cast %116 : vector<128xf32> to vector<1x128xf32>
    %c8_i32_56 = arith.constant 8 : i32
    %118 = tpu.dynamic_rotate %114 by %c8_i32_56 dim 1 : vector<1x128xf32>, i32 -> vector<1x128xf32>
    %119 = arith.addf %114, %118 : vector<1x128xf32>
    %c8_i32_57 = arith.constant 8 : i32
    %120 = tpu.dynamic_rotate %117 by %c8_i32_57 dim 1 : vector<1x128xf32>, i32 -> vector<1x128xf32>
    %121 = arith.addf %117, %120 : vector<1x128xf32>
    %c16_i32_58 = arith.constant 16 : i32
    %122 = tpu.dynamic_rotate %119 by %c16_i32_58 dim 1 : vector<1x128xf32>, i32 -> vector<1x128xf32>
    %123 = arith.addf %119, %122 : vector<1x128xf32>
    %c16_i32_59 = arith.constant 16 : i32
    %124 = tpu.dynamic_rotate %121 by %c16_i32_59 dim 1 : vector<1x128xf32>, i32 -> vector<1x128xf32>
    %125 = arith.addf %121, %124 : vector<1x128xf32>
    %c32_i32_60 = arith.constant 32 : i32
    %126 = tpu.dynamic_rotate %123 by %c32_i32_60 dim 1 : vector<1x128xf32>, i32 -> vector<1x128xf32>
    %127 = arith.addf %123, %126 : vector<1x128xf32>
    %c32_i32_61 = arith.constant 32 : i32
    %128 = tpu.dynamic_rotate %125 by %c32_i32_61 dim 1 : vector<1x128xf32>, i32 -> vector<1x128xf32>
    %129 = arith.addf %125, %128 : vector<1x128xf32>
    %c64_i32_62 = arith.constant 64 : i32
    %130 = tpu.dynamic_rotate %127 by %c64_i32_62 dim 1 : vector<1x128xf32>, i32 -> vector<1x128xf32>
    %131 = arith.addf %127, %130 : vector<1x128xf32>
    %c64_i32_63 = arith.constant 64 : i32
    %132 = tpu.dynamic_rotate %129 by %c64_i32_63 dim 1 : vector<1x128xf32>, i32 -> vector<1x128xf32>
    %133 = arith.addf %129, %132 : vector<1x128xf32>
    %cst_64 = arith.constant 0.001953125 : f32
    %134 = vector.broadcast %cst_64 : f32 to vector<1x128xf32>
    %135 = arith.mulf %131, %134 : vector<1x128xf32>
    %cst_65 = arith.constant 0.001953125 : f32
    %136 = vector.broadcast %cst_65 : f32 to vector<1x128xf32>
    %137 = arith.mulf %133, %136 : vector<1x128xf32>
    %138 = arith.mulf %135, %135 : vector<1x128xf32>
    %139 = arith.subf %137, %138 : vector<1x128xf32>
    %cst_66 = arith.constant 9.99999974E-6 : f32
    %140 = vector.broadcast %cst_66 : f32 to vector<1x128xf32>
    %141 = arith.addf %139, %140 : vector<1x128xf32>
    %142 = math.rsqrt %141 : vector<1x128xf32>
    %143 = vector.broadcast %135 : vector<1x128xf32> to vector<32x128xf32>
    %144 = arith.subf %110, %143 : vector<32x128xf32>
    %145 = arith.mulf %142, %111 : vector<1x128xf32>
    %146 = vector.broadcast %145 : vector<1x128xf32> to vector<32x128xf32>
    %147 = arith.mulf %144, %146 : vector<32x128xf32>
    %148 = vector.broadcast %112 : vector<1x128xf32> to vector<32x128xf32>
    %149 = arith.addf %147, %148 : vector<32x128xf32>
    %150 = arith.addf %0, %149 : vector<32x128xf32>
    %c0_67 = arith.constant 0 : index
    %c0_68 = arith.constant 0 : index
    %151 = vector.load %arg7[%c0_67, %c0_68] : memref<32x128xf32, #tpu.memory_space<vmem>>, vector<32x128xf32>
    tpu.vector_store %arg7[%c0_67, %c0_68], %150 {strides = array<i32>} : memref<32x128xf32, #tpu.memory_space<vmem>>, vector<32x128xf32>,
    return
  }
}

</mosaic_0001>

<bundles_post_ra>
// kernel: tile.23
= control target key start
LH: loop header
LB: loop body
LE: loop exit
PB: predicated region body
PF: predicated region fallthrough
CT: control target
= control target key end

     0   :  { %s28_s0 = inlined_call_operand.vmem [shape: f32[8], index: 0, kind: input, shape index: {}]   ;;  %s29_s1 = inlined_call_operand.vmem [shape: f32[16,8], index: 1, kind: output, shape index: {}]  }
   0x1   :  { %v4_v0 = vld [vmem:[%s28_s0] ss:$0 sm:$0xff] }
   0x2   :  { %5 = vst [vmem:[%s29_s1] sm:$0xff] %v4_v0 }
   0x3   :  { %8 = vst [vmem:[%s29_s1 + $0x8] sm:$0xff] %v4_v0 }

// kernel: tile.24
= control target key start
LH: loop header
LB: loop body
LE: loop exit
PB: predicated region body
PF: predicated region fallthrough
CT: control target
= control target key end

     0   :  { %s131_s10 = smov 120   ;;  %s132_s11 = smov 104   ;;  %vm3_vm0 = vcmask 64512   ;;  %vm9_vm1 = vcmask 1048512   ;;  %vm15_vm2 = vcmask 982912   ;;  %vm21_vm3 = vcmask 917312   ;;  %s207_s0 = inlined_call_operand.vmem [shape: f32[16,8], index: 0, kind: input, shape index: {}]   ;;  %s208_s1 = inlined_call_operand.vmem [shape: f32[1,128], index: 1, kind: output, shape index: {}]  }
   0x1   :  { %v101_v0 = vld [vmem:[%s207_s0 + $0xf] sm:$0x1]   ;;  %v103_v1 = vld [vmem:[%s207_s0 + $0xd] sm:$0x1]   ;;  %v105_v2 = vld [vmem:[%s207_s0 + $0xb] sm:$0x1]  }
   0x2   :  { %7 = vrot.lane.b32.xlu0 %v101_v0, %s131_s10  ;;  %19 = vrot.lane.b32.xlu1 %v103_v1, %s132_s11  ;;  %s133_s14 = smov 88   ;;  %v102_v3 = vld [vmem:[%s207_s0 + $0xe] sm:$0x1]   ;;  %v104_v4 = vld [vmem:[%s207_s0 + $0xc] sm:$0x1]   ;;  %s134_s19 = smov 112  }
   0x3   :  { %31 = vrot.lane.b32.xlu2 %v105_v2, %s133_s14  ;;  %s135_s20 = smov 96   ;;  %v106_v5 = vld [vmem:[%s207_s0 + $0xa] sm:$0x1]   ;;  %s136_s23 = smov 80   ;;  %v107_v6 = vld [vmem:[%s207_s0 + $0x9] sm:$0x1]  }
   0x4   :  { %v108_v7 = vld [vmem:[%s207_s0 + $0x8] sm:$0x1]   ;;  %s137_s28 = smov 72   ;;  %s138_s29 = smov 64   ;;  %v109_v8 = vld [vmem:[%s207_s0 + $0x7] sm:$0x1]  }
   0x5   :  { %s139_s3 = smov 56   ;;  %v110_v9 = vld [vmem:[%s207_s0 + $0x6] sm:$0x1]   ;;  %v111_v10 = vld [vmem:[%s207_s0 + $0x5] sm:$0x1]   ;;  %s140_s8 = smov 48  }
   0x6   :  { %s141_s9 = smov 40   ;;  %v112_v11 = vld [vmem:[%s207_s0 + $0x4] sm:$0x1]   ;;  %s142_s12 = smov 32   ;;  %v113_v12 = vld [vmem:[%s207_s0 + $0x3] sm:$0x1]  }
   0x7   :  { %v114_v13 = vld [vmem:[%s207_s0 + $0x2] sm:$0x1]   ;;  %s143_s17 = smov 24   ;;  %s144_s18 = smov 16   ;;  %v115_v14 = vld [vmem:[%s207_s0 + $0x1] sm:$0x1]  }
   0x8   :  { %s145_s21 = smov 8   ;;  %v2_v15 = vld [vmem:[%s207_s0] sm:$0x1]   ;;  %vm27_vm4 = vcmask 851712   ;;  %vm33_vm5 = vcmask 786112   ;;  %vm39_vm6 = vcmask 720512  }
   0x9   :  { %4 = vst.msk [vmem:[#allocation0] sm:$0x1] %vm3_vm0, %v2_v15   ;;  %vm45_vm7 = vcmask 654912   ;;  %vm51_vm8 = vcmask 589312   ;;  %vm57_vm9 = vcmask 523712   ;;  %vm63_vm10 = vcmask 458112  }
   0xa   :  { %13 = vrot.lane.b32.xlu0 %v102_v3, %s134_s19  ;;  %25 = vrot.lane.b32.xlu1 %v104_v4, %s135_s20  ;;  %vm69_vm11 = vcmask 392512   ;;  %vm75_vm12 = vcmask 326912   ;;  %vm81_vm13 = vcmask 261312   ;;  %vm87_vm14 = vcmask 195712  }
   0xb   :  { %37 = vrot.lane.b32.xlu2 %v106_v5, %s136_s23  ;;  %vm93_vm15 = vcmask 130112  }
  0x12   :  { %43 = vrot.lane.b32.xlu0 %v107_v6, %s137_s28  ;;  %49 = vrot.lane.b32.xlu1 %v108_v7, %s138_s29 }
  0x13   :  { %55 = vrot.lane.b32.xlu2 %v109_v8, %s139_s3 }
  0x1a   :  { %61 = vrot.lane.b32.xlu0 %v110_v9, %s140_s8  ;;  %67 = vrot.lane.b32.xlu1 %v111_v10, %s141_s9 }
  0x1b   :  { %73 = vrot.lane.b32.xlu2 %v112_v11, %s142_s12 }
  0x22   :  { %79 = vrot.lane.b32.xlu0 %v113_v12, %s143_s17  ;;  %85 = vrot.lane.b32.xlu1 %v114_v13, %s144_s18 }
  0x23   :  { %91 = vrot.lane.b32.xlu2 %v115_v14, %s145_s21 }
  0x5d   :  { %v32_v16 = vpop.permute.xlu2 %31  }
  0x65   :  { %v38_v17 = vpop.permute.xlu2 %37  }
  0x6d   :  { %v56_v18 = vpop.permute.xlu2 %55  }
  0x74   :  { %v8_v19 = vpop.permute.xlu0 %7   ;;  %v20_v20 = vpop.permute.xlu1 %19  }
  0x75   :  { %10 = vst.msk [vmem:[#allocation0] sm:$0x1] %vm9_vm1, %v8_v19   ;;  %v74_v21 = vpop.permute.xlu2 %73  }
  0x7c   :  { %v14_v22 = vpop.permute.xlu0 %13   ;;  %v26_v23 = vpop.permute.xlu1 %25  }
  0x7d   :  { %16 = vst.msk [vmem:[#allocation0] sm:$0x1] %vm15_vm2, %v14_v22   ;;  %v92_v24 = vpop.permute.xlu2 %91  }
  0x7e   :  { %22 = vst.msk [vmem:[#allocation0] sm:$0x1] %vm21_vm3, %v20_v20  }
  0x7f   :  { %28 = vst.msk [vmem:[#allocation0] sm:$0x1] %vm27_vm4, %v26_v23  }
  0x80   :  { %34 = vst.msk [vmem:[#allocation0] sm:$0x1] %vm33_vm5, %v32_v16  }
  0x81   :  { %40 = vst.msk [vmem:[#allocation0] sm:$0x1] %vm39_vm6, %v38_v17  }
  0x84   :  { %v44_v25 = vpop.permute.xlu0 %43   ;;  %v50_v26 = vpop.permute.xlu1 %49  }
  0x85   :  { %46 = vst.msk [vmem:[#allocation0] sm:$0x1] %vm45_vm7, %v44_v25  }
  0x86   :  { %52 = vst.msk [vmem:[#allocation0] sm:$0x1] %vm51_vm8, %v50_v26  }
  0x87   :  { %58 = vst.msk [vmem:[#allocation0] sm:$0x1] %vm57_vm9, %v56_v18  }
  0x8c   :  { %v62_v27 = vpop.permute.xlu0 %61   ;;  %v68_v28 = vpop.permute.xlu1 %67  }
  0x8d   :  { %64 = vst.msk [vmem:[#allocation0] sm:$0x1] %vm63_vm10, %v62_v27  }
  0x8e   :  { %70 = vst.msk [vmem:[#allocation0] sm:$0x1] %vm69_vm11, %v68_v28  }
  0x8f   :  { %76 = vst.msk [vmem:[#allocation0] sm:$0x1] %vm75_vm12, %v74_v21  }
  0x94   :  { %v80_v29 = vpop.permute.xlu0 %79   ;;  %v86_v30 = vpop.permute.xlu1 %85  }
  0x95   :  { %82 = vst.msk [vmem:[#allocation0] sm:$0x1] %vm81_vm13, %v80_v29  }
  0x96   :  { %88 = vst.msk [vmem:[#allocation0] sm:$0x1] %vm87_vm14, %v86_v30  }
  0x97   :  { %94 = vst.msk [vmem:[#allocation0] sm:$0x1] %vm93_vm15, %v92_v24  }
  0x9e   :  { %v97_v31 = vld [vmem:[#allocation0] sm:$0x1] }
  0x9f   :  { %100 = vst [vmem:[%s208_s1] sm:$0x1] %v97_v31 }

// kernel: residual_block.1
= control target key start
LH: loop header
LB: loop body
LE: loop exit
PB: predicated region body
PF: predicated region fallthrough
CT: control target
= control target key end

     0   :  { %v30_v15 = vlaneseq  ;;  %v752_v57 = vmov 0.0   ;;  %s754_s12 = smov 16   ;;  %s755_s13 = smov 32   ;;  %s1333_s1 = inlined_call_operand.vmem [shape: f32[3,128,128], index: 1, kind: input, shape index: {}]   ;;  %s1334_s0 = inlined_call_operand.vmem [shape: f32[32,128], index: 0, kind: input, shape index: {}]   ;;  %s1335_s4 = inlined_call_operand.vmem [shape: f32[1,128], index: 4, kind: input, shape index: {}]   ;;  %s1336_s2 = inlined_call_operand.vmem [shape: f32[3,128,128], index: 2, kind: input, shape index: {}]   ;;  %s1337_s3 = inlined_call_operand.vmem [shape: f32[1,128], index: 3, kind: input, shape index: {}]   ;;  %s1338_s6 = inlined_call_operand.vmem [shape: f32[1,128], index: 6, kind: input, shape index: {}]   ;;  %s1339_s5 = inlined_call_operand.vmem [shape: f32[1,128], index: 5, kind: input, shape index: {}]   ;;  %s1340_s7 = inlined_call_operand.vmem [shape: f32[32,128], index: 7, kind: output, shape index: {}]  }
   0x1   :  { %v676_v0 = vld [vmem:[%s1333_s1 + $0x178] sm:$0xff]  ;;  %v675_v1 = vld [vmem:[%s1333_s1 + $0x170] sm:$0xff]  ;;  %v674_v5 = vld [vmem:[%s1333_s1 + $0x168] sm:$0xff]  ;;  %s756_s14 = smov 64  }
   0x2   :  { %v660_v2 = vld [vmem:[%s1333_s1 + $0xf8] sm:$0xff]  ;;  %265 = vmatpush.msra.mxu2 %v676_v0  ;;  %v659_v4 = vld [vmem:[%s1333_s1 + $0xf0] sm:$0xff]  ;;  %v658_v7 = vld [vmem:[%s1333_s1 + $0xe8] sm:$0xff]  ;;  %v860_v22 = vshrl.u32 %v30_v15, 7 }
   0x3   :  { %177 = vmatpush.msra.mxu0 %v660_v2  ;;  %v159_v3 = vld [vmem:[%s1333_s1 + $0x78] sm:$0xff]  ;;  %v158_v6 = vld [vmem:[%s1333_s1 + $0x70] sm:$0xff]  ;;  %v157_v8 = vld [vmem:[%s1333_s1 + $0x68] sm:$0xff] }
   0x4   :  { %206 = vmatpush.msra.mxu1 %v159_v3  ;;  %266 = vmatpush.msra.mxu2 %v675_v1  ;;  %v673_v9 = vld [vmem:[%s1333_s1 + $0x160] sm:$0xff]  ;;  %v672_v12 = vld [vmem:[%s1333_s1 + $0x158] sm:$0xff]  ;;  %v671_v16 = vld [vmem:[%s1333_s1 + $0x150] sm:$0xff]  ;;  %v39_v29 = vand.u32 15, %v860_v22  ;;  %v32_v35 = vadd.s32 8, %v860_v22  ;;  %vm135_vm1 = vcmp.lt.s32.totalorder %v860_v22, 1 }
   0x5   :  { %178 = vmatpush.msra.mxu0 %v659_v4  ;;  %v657_v10 = vld [vmem:[%s1333_s1 + $0xe0] sm:$0xff]  ;;  %v656_v13 = vld [vmem:[%s1333_s1 + $0xd8] sm:$0xff]  ;;  %v655_v17 = vld [vmem:[%s1333_s1 + $0xd0] sm:$0xff]  ;;  %vm239_vm2 = vcmp.lt.s32.totalorder %v860_v22, 7  ;;  %v33_v63 = vadd.s32 16, %v860_v22 }
   0x6   :  { %207 = vmatpush.msra.mxu1 %v158_v6  ;;  %267 = vmatpush.msra.mxu2 %v674_v5  ;;  %v156_v11 = vld [vmem:[%s1333_s1 + $0x60] sm:$0xff]  ;;  %v155_v14 = vld [vmem:[%s1333_s1 + $0x58] sm:$0xff]  ;;  %v154_v18 = vld [vmem:[%s1333_s1 + $0x50] sm:$0xff]  ;;  %v83_v38 = vadd.s32 4294967295, %v39_v29  ;;  %v46_v48 = vand.u32 15, %v32_v35 }
   0x7   :  { %179 = vmatpush.msra.mxu0 %v658_v7  ;;  %v670_v19 = vld [vmem:[%s1333_s1 + $0x148] sm:$0xff]  ;;  %v669_v23 = vld [vmem:[%s1333_s1 + $0x140] sm:$0xff]  ;;  %v668_v26 = vld [vmem:[%s1333_s1 + $0x138] sm:$0xff]  ;;  %v53_v6 = vand.u32 15, %v33_v63 }
   0x8   :  { %208 = vmatpush.msra.mxu1 %v157_v8  ;;  %268 = vmatpush.msra.mxu2 %v673_v9  ;;  %v654_v20 = vld [vmem:[%s1333_s1 + $0xc8] sm:$0xff]  ;;  %v653_v24 = vld [vmem:[%s1333_s1 + $0xc0] sm:$0xff]  ;;  %v652_v27 = vld [vmem:[%s1333_s1 + $0xb8] sm:$0xff]  ;;  %vm87_vm0 = vcmp.ge.s32.totalorder %v83_v38, 0  ;;  %v108_v61 = vadd.s32 1, %v46_v48 }
   0x9   :  { %180 = vmatpush.msra.mxu0 %v657_v10  ;;  %v153_v21 = vld [vmem:[%s1333_s1 + $0x48] sm:$0xff]  ;;  %v152_v25 = vld [vmem:[%s1333_s1 + $0x40] sm:$0xff]  ;;  %v151_v28 = vld [vmem:[%s1333_s1 + $0x38] sm:$0xff]  ;;  %v954_v58 = vsel %vm87_vm0, 1.0, %v752_v57  ;;  %v34_v10 = vadd.s32 24, %v860_v22 }
   0xa   :  { %209 = vmatpush.msra.mxu1 %v156_v11  ;;  %269 = vmatpush.msra.mxu2 %v672_v12  ;;  %v667_v30 = vld [vmem:[%s1333_s1 + $0x130] sm:$0xff]  ;;  %v666_v33 = vld [vmem:[%s1333_s1 + $0x128] sm:$0xff]  ;;  %v903_v37 = vld [vmem:[%s1334_s0 + $0x18] sm:$0xff]  ;;  %vm116_vm3 = vcmp.lt.s32.totalorder %v108_v61, 16  ;;  %v85_v11 = vadd.s32 4294967295, %v53_v6 }
   0xb   :  { %181 = vmatpush.msra.mxu0 %v656_v13  ;;  %v651_v31 = vld [vmem:[%s1333_s1 + $0xb0] sm:$0xff]  ;;  %v650_v34 = vld [vmem:[%s1333_s1 + $0xa8] sm:$0xff]  ;;  %v665_v39 = vld [vmem:[%s1333_s1 + $0x120] sm:$0xff]  ;;  %v134_v47 = vrot.slane %v903_v37, 7  ;;  %v983_v7 = vsel %vm116_vm3, 1.0, %v752_v57  ;;  %v60_v15 = vand.u32 15, %v34_v10 }
   0xc   :  { %210 = vmatpush.msra.mxu1 %v155_v14  ;;  %270 = vmatpush.msra.mxu2 %v671_v16  ;;  %v150_v32 = vld [vmem:[%s1333_s1 + $0x30] sm:$0xff]  ;;  %v149_v36 = vld [vmem:[%s1333_s1 + $0x28] sm:$0xff]  ;;  %v649_v40 = vld [vmem:[%s1333_s1 + $0xa0] sm:$0xff]  ;;  %vm89_vm4 = vcmp.ge.s32.totalorder %v85_v11, 0  ;;  %v238_v16 = vrot.slane %v903_v37, 1 }
   0xd   :  { %182 = vmatpush.msra.mxu0 %v655_v17  ;;  %v148_v41 = vld [vmem:[%s1333_s1 + $0x20] sm:$0xff]  ;;  %v664_v43 = vld [vmem:[%s1333_s1 + $0x118] sm:$0xff]  ;;  %v928_v45 = vld [vmem:[%s1334_s0 + $0x8] sm:$0xff]  ;;  %v995_v17 = vsel %vm89_vm4, 1.0, %v752_v57 }
   0xe   :  { %211 = vmatpush.msra.mxu1 %v154_v18  ;;  %271 = vmatpush.msra.mxu2 %v670_v19  ;;  %v917_v42 = vld [vmem:[%s1334_s0] sm:$0xff]  ;;  %v648_v44 = vld [vmem:[%s1333_s1 + $0x98] sm:$0xff]  ;;  %v663_v50 = vld [vmem:[%s1333_s1 + $0x110] sm:$0xff]  ;;  %v236_v54 = vrot.slane %v928_v45, 1  ;;  %v132_v9 = vrot.slane %v928_v45, 7  ;;  %v110_v19 = vadd.s32 1, %v60_v15 }
   0xf   :  { %183 = vmatpush.msra.mxu0 %v654_v20  ;;  %v131_v46 = vrot.slane %v917_v42, 7  ;;  %v147_v49 = vld [vmem:[%s1333_s1 + $0x18] sm:$0xff]  ;;  %v647_v51 = vld [vmem:[%s1333_s1 + $0x90] sm:$0xff]  ;;  %v235_v53 = vrot.slane %v917_v42, 1  ;;  %v662_v55 = vld [vmem:[%s1333_s1 + $0x108] sm:$0xff] }
  0x10   :  { %212 = vmatpush.msra.mxu1 %v153_v21  ;;  %272 = vmatpush.msra.mxu2 %v669_v23  ;;  %v146_v52 = vld [vmem:[%s1333_s1 + $0x10] sm:$0xff]  ;;  %v646_v56 = vld [vmem:[%s1333_s1 + $0x88] sm:$0xff]  ;;  %v661_v0 = vld [vmem:[%s1333_s1 + $0x100] sm:$0xff]  ;;  %vm118_vm5 = vcmp.lt.s32.totalorder %v110_v19, 16 }
  0x11   :  { %184 = vmatpush.msra.mxu0 %v653_v24  ;;  %v139_v59 = vsel %vm135_vm1, %v134_v47, %v131_v46  ;;  %v963_v60 = vld [vmem:[%s1334_s0 + $0x10] sm:$0xff]  ;;  %v145_v62 = vld [vmem:[%s1333_s1 + $0x8] sm:$0xff]  ;;  %v645_v1 = vld [vmem:[%s1333_s1 + $0x80] sm:$0xff]  ;;  %v242_v2 = vsel %vm239_vm2, %v235_v53, %v236_v54  ;;  %v138_v13 = vsel %vm135_vm1, %v131_v46, %v132_v9  ;;  %v1003_v23 = vsel %vm118_vm5, 1.0, %v752_v57 }
  0x12   :  { %213 = vmatpush.msra.mxu1 %v152_v25  ;;  %273 = vmatpush.msra.mxu2 %v668_v26  ;;  %v144_v3 = vld [vmem:[%s1333_s1] sm:$0xff]  ;;  %v140_v4 = vmul.f32 %v954_v58, %v139_v59  ;;  %v237_v5 = vrot.slane %v963_v60, 1  ;;  %v133_v14 = vrot.slane %v963_v60, 7  ;;  %v243_v24 = vsel %vm239_vm2, %v238_v16, %v235_v53  ;;  %s753_s1 = smov 8  }
  0x13   :  { %185 = vmatpush.msra.mxu0 %v652_v27  ;;  %v247_v25 = vmul.f32 %v1003_v23, %v243_v24 }
  0x14   :  { %214 = vmatpush.msra.mxu1 %v151_v28  ;;  %274 = vmatpush.msra.mxu2 %v667_v30  ;;  %v241_v8 = vsel %vm239_vm2, %v236_v54, %v237_v5  ;;  %v137_v18 = vsel %vm135_vm1, %v132_v9, %v133_v14  ;;  %v240_v20 = vsel %vm239_vm2, %v237_v5, %v238_v16 }
  0x15   :  { %186 = vmatpush.msra.mxu0 %v651_v31  ;;  %v245_v12 = vmul.f32 %v983_v7, %v241_v8  ;;  %v142_v21 = vmul.f32 %v995_v17, %v137_v18  ;;  %v136_v26 = vsel %vm135_vm1, %v133_v14, %v134_v47 }
  0x16   :  { %215 = vmatpush.msra.mxu1 %v150_v32  ;;  %275 = vmatpush.msra.mxu2 %v666_v33 }
  0x17   :  { %187 = vmatpush.msra.mxu0 %v650_v34 }
  0x18   :  { %216 = vmatpush.msra.mxu1 %v149_v36  ;;  %276 = vmatpush.msra.mxu2 %v665_v39 }
  0x19   :  { %188 = vmatpush.msra.mxu0 %v649_v40 }
  0x1a   :  { %217 = vmatpush.msra.mxu1 %v148_v41  ;;  %277 = vmatpush.msra.mxu2 %v664_v43 }
  0x1b   :  { %189 = vmatpush.msra.mxu0 %v648_v44 }
  0x1c   :  { %218 = vmatpush.msra.mxu1 %v147_v49  ;;  %278 = vmatpush.msra.mxu2 %v663_v50 }
  0x1d   :  { %190 = vmatpush.msra.mxu0 %v647_v51 }
  0x1e   :  { %219 = vmatpush.msra.mxu1 %v146_v52  ;;  %279 = vmatpush.msra.mxu2 %v662_v55 }
  0x1f   :  { %191 = vmatpush.msra.mxu0 %v646_v56 }
  0x20   :  { %220 = vmatpush.msra.mxu1 %v145_v62  ;;  %280 = vmatpush.msra.mxu2 %v661_v0 }
  0x21   :  { %192 = vmatpush.msra.mxu0 %v645_v1  ;;  %281 = vmatmul.f32.vlgmr.msra.gmra.mxu2 %v242_v2 }
  0x22   :  { %221 = vmatpush.msra.mxu1 %v144_v3  ;;  %193 = vmatmul.f32.vlgmr.msra.gmra.mxu0 %v917_v42 }
  0x23   :  { %222 = vmatmul.f32.vlgmr.msra.gmra.mxu1 %v140_v4 }
  0x29   :  { %284 = vmatmul.f32.gmra.mxu2 %v245_v12 }
  0x2a   :  { %196 = vmatmul.f32.gmra.mxu0 %v928_v45 }
  0x2b   :  { %225 = vmatmul.f32.gmra.mxu1 %v138_v13 }
  0x31   :  { %287 = vmatmul.f32.gmra.mxu2 %v240_v20 }
  0x32   :  { %199 = vmatmul.f32.gmra.mxu0 %v963_v60 }
  0x33   :  { %228 = vmatmul.f32.gmra.mxu1 %v142_v21 }
  0x39   :  { %290 = vmatmul.f32.gmra.mxu2 %v247_v25 }
  0x3a   :  { %202 = vmatmul.f32.gmra.mxu0 %v903_v37 }
  0x3b   :  { %231 = vmatmul.f32.gmra.mxu1 %v136_v26  ;;  %v692_v26 = vld [vmem:[%s1336_s2 + $0xf8] sm:$0xff] }
  0x3c   :  { %428 = vmatpush.msra.mxu3 %v692_v26  ;;  %v397_v26 = vld [vmem:[%s1336_s2 + $0x10] sm:$0xff] }
  0x9f   :  { %v194_v27 = vpop.f32.mrf.mxu0 }
  0xa0   :  { %v223_v28 = vpop.f32.mrf.mxu1 }
  0xa1   :  { %v224_v36 = vadd.f32 %v223_v28, %v194_v27  ;;  %v691_v27 = vld [vmem:[%s1336_s2 + $0xf0] sm:$0xff]  ;;  %v1056_v28 = vld [vmem:[%s1336_s2 + $0x178] sm:$0xff] }
  0xa2   :  { %429 = vmatpush.msra.mxu3 %v691_v27  ;;  %515 = vmatpush.msrb.mxu1 %v1056_v28  ;;  %v694_v27 = vld [vmem:[%s1336_s2 + $0x108] sm:$0xff] }
  0xa4   :  { %v282_v29 = vpop.f32.mrf.mxu2 }
  0xa5   :  { %v1015_v41 = vadd.f32 %v282_v29, %v224_v36  ;;  %v690_v29 = vld [vmem:[%s1336_s2 + $0xe8] sm:$0xff] }
  0xa6   :  { %430 = vmatpush.msra.mxu3 %v690_v29  ;;  %v408_v36 = vld [vmem:[%s1336_s2 + $0x68] sm:$0xff] }
  0xa7   :  { %v197_v30 = vpop.f32.mrf.mxu0  ;;  %v309_v49 = vmul.f32 %v1015_v41, %v1015_v41  ;;  %v396_v29 = vld [vmem:[%s1336_s2 + $0x8] sm:$0xff] }
  0xa8   :  { %v226_v31 = vpop.f32.mrf.mxu1 }
  0xa9   :  { %v227_v35 = vadd.f32 %v226_v31, %v197_v30  ;;  %v410_v30 = vld [vmem:[%s1336_s2 + $0x78] sm:$0xff]  ;;  %v1068_v31 = vld [vmem:[%s1336_s2 + $0x170] sm:$0xff] }
  0xaa   :  { %457 = vmatpush.msrb.mxu0 %v410_v30  ;;  %709 = vmatpush.msrb.mxu2 %v410_v30  ;;  %v693_v30 = vld [vmem:[%s1336_s2 + $0x100] sm:$0xff] }
  0xab   :  { %516 = vmatpush.msrb.mxu1 %v1068_v31 }
  0xac   :  { %v285_v32 = vpop.f32.mrf.mxu2 }
  0xad   :  { %v1013_v40 = vadd.f32 %v285_v32, %v227_v35  ;;  %v689_v32 = vld [vmem:[%s1336_s2 + $0xe0] sm:$0xff]  ;;  %v688_v35 = vld [vmem:[%s1336_s2 + $0xd8] sm:$0xff] }
  0xae   :  { %431 = vmatpush.msra.mxu3 %v689_v32 }
  0xaf   :  { %v200_v33 = vpop.f32.mrf.mxu0  ;;  %v310_v47 = vmul.f32 %v1013_v40, %v1013_v40  ;;  %v300_v50 = vadd.f32 %v1013_v40, %v1015_v41 }
  0xb0   :  { %v229_v34 = vpop.f32.mrf.mxu1  ;;  %432 = vmatpush.msra.mxu3 %v688_v35 }
  0xb1   :  { %v230_v38 = vadd.f32 %v229_v34, %v200_v33  ;;  %v313_v53 = vadd.f32 %v310_v47, %v309_v49  ;;  %v409_v33 = vld [vmem:[%s1336_s2 + $0x70] sm:$0xff]  ;;  %v1080_v34 = vld [vmem:[%s1336_s2 + $0x168] sm:$0xff] }
  0xb2   :  { %458 = vmatpush.msrb.mxu0 %v409_v33  ;;  %710 = vmatpush.msrb.mxu2 %v409_v33  ;;  %v686_v47 = vld [vmem:[%s1336_s2 + $0xc8] sm:$0xff]  ;;  %v1116_v49 = vld [vmem:[%s1336_s2 + $0x150] sm:$0xff] }
  0xb3   :  { %517 = vmatpush.msrb.mxu1 %v1080_v34 }
  0xb4   :  { %v288_v39 = vpop.f32.mrf.mxu2  ;;  %459 = vmatpush.msrb.mxu0 %v408_v36  ;;  %711 = vmatpush.msrb.mxu2 %v408_v36 }
  0xb5   :  { %v1017_v43 = vadd.f32 %v288_v39, %v230_v38  ;;  %v1092_v38 = vld [vmem:[%s1336_s2 + $0x160] sm:$0xff]  ;;  %v687_v39 = vld [vmem:[%s1336_s2 + $0xd0] sm:$0xff] }
  0xb6   :  { %518 = vmatpush.msrb.mxu1 %v1092_v38  ;;  %433 = vmatpush.msra.mxu3 %v687_v39 }
  0xb7   :  { %v203_v44 = vpop.f32.mrf.mxu0  ;;  %v311_v51 = vmul.f32 %v1017_v43, %v1017_v43  ;;  %v301_v54 = vadd.f32 %v300_v50, %v1017_v43  ;;  %v685_v50 = vld [vmem:[%s1336_s2 + $0xc0] sm:$0xff] }
  0xb8   :  { %v232_v46 = vpop.f32.mrf.mxu1  ;;  %434 = vmatpush.msra.mxu3 %v686_v47 }
  0xb9   :  { %v233_v48 = vadd.f32 %v232_v46, %v203_v44  ;;  %v314_v56 = vadd.f32 %v313_v53, %v311_v51  ;;  %v407_v44 = vld [vmem:[%s1336_s2 + $0x60] sm:$0xff]  ;;  %v1104_v46 = vld [vmem:[%s1336_s2 + $0x158] sm:$0xff]  ;;  %v405_v51 = vld [vmem:[%s1336_s2 + $0x50] sm:$0xff] }
  0xba   :  { %460 = vmatpush.msrb.mxu0 %v407_v44  ;;  %712 = vmatpush.msrb.mxu2 %v407_v44  ;;  %v684_v53 = vld [vmem:[%s1336_s2 + $0xb8] sm:$0xff] }
  0xbb   :  { %519 = vmatpush.msrb.mxu1 %v1104_v46  ;;  %435 = vmatpush.msra.mxu3 %v685_v50 }
  0xbc   :  { %v291_v52 = vpop.f32.mrf.mxu2 }
  0xbd   :  { %v1028_v55 = vadd.f32 %v291_v52, %v233_v48  ;;  %v406_v48 = vld [vmem:[%s1336_s2 + $0x58] sm:$0xff]  ;;  %520 = vmatpush.msrb.mxu1 %v1116_v49  ;;  %v1128_v52 = vld [vmem:[%s1336_s2 + $0x148] sm:$0xff]  ;;  %436 = vmatpush.msra.mxu3 %v684_v53  ;;  %v746_v53 = vld [vmem:[%s1335_s4] ss:$0 sm:$0xff] }
  0xbe   :  { %461 = vmatpush.msrb.mxu0 %v406_v48  ;;  %713 = vmatpush.msrb.mxu2 %v406_v48 }
  0xbf   :  { %v302_v57 = vadd.f32 %v301_v54, %v1028_v55  ;;  %v312_v59 = vmul.f32 %v1028_v55, %v1028_v55  ;;  %521 = vmatpush.msrb.mxu1 %v1128_v52  ;;  %v404_v54 = vld [vmem:[%s1336_s2 + $0x48] sm:$0xff] }
  0xc0   :  { %462 = vmatpush.msrb.mxu0 %v405_v51  ;;  %714 = vmatpush.msrb.mxu2 %v405_v51 }
  0xc1   :  { %v303_v61 = vrot.slane %v302_v57, 4  ;;  %v315_v62 = vadd.f32 %v314_v56, %v312_v59  ;;  %v1140_v56 = vld [vmem:[%s1336_s2 + $0x140] sm:$0xff] }
  0xc2   :  { %463 = vmatpush.msrb.mxu0 %v404_v54  ;;  %715 = vmatpush.msrb.mxu2 %v404_v54 }
  0xc3   :  { %v316_v63 = vrot.slane %v315_v62, 4  ;;  %v304_v0 = vadd.f32 %v303_v61, %v302_v57  ;;  %v683_v57 = vld [vmem:[%s1336_s2 + $0xb0] sm:$0xff]  ;;  %522 = vmatpush.msrb.mxu1 %v1140_v56  ;;  %v403_v61 = vld [vmem:[%s1336_s2 + $0x40] sm:$0xff] }
  0xc4   :  { %437 = vmatpush.msra.mxu3 %v683_v57  ;;  %464 = vmatpush.msrb.mxu0 %v403_v61 }
  0xc5   :  { %v305_v1 = vrot.slane %v304_v0, 2  ;;  %v317_v2 = vadd.f32 %v316_v63, %v315_v62  ;;  %v1152_v62 = vld [vmem:[%s1336_s2 + $0x138] sm:$0xff]  ;;  %716 = vmatpush.msrb.mxu2 %v403_v61  ;;  %v682_v63 = vld [vmem:[%s1336_s2 + $0xa8] sm:$0xff] }
  0xc6   :  { %523 = vmatpush.msrb.mxu1 %v1152_v62  ;;  %438 = vmatpush.msra.mxu3 %v682_v63 }
  0xc7   :  { %v306_v3 = vadd.f32 %v305_v1, %v304_v0  ;;  %v318_v4 = vrot.slane %v317_v2, 2  ;;  %v402_v0 = vld [vmem:[%s1336_s2 + $0x38] sm:$0xff]  ;;  %v1164_v1 = vld [vmem:[%s1336_s2 + $0x130] sm:$0xff] }
  0xc8   :  { %465 = vmatpush.msrb.mxu0 %v402_v0  ;;  %717 = vmatpush.msrb.mxu2 %v402_v0 }
  0xc9   :  { %v307_v5 = vrot.slane %v306_v3, 1  ;;  %v319_v8 = vadd.f32 %v318_v4, %v317_v2  ;;  %524 = vmatpush.msrb.mxu1 %v1164_v1  ;;  %v401_v4 = vld [vmem:[%s1336_s2 + $0x30] sm:$0xff] }
  0xca   :  { %466 = vmatpush.msrb.mxu0 %v401_v4  ;;  %718 = vmatpush.msrb.mxu2 %v401_v4 }
  0xcb   :  { %v308_v6 = vadd.f32 %v307_v5, %v306_v3  ;;  %v320_v9 = vrot.slane %v319_v8, 1  ;;  %v681_v3 = vld [vmem:[%s1336_s2 + $0xa0] sm:$0xff]  ;;  %v1177_v5 = vld [vmem:[%s1336_s2 + $0x128] sm:$0xff] }
  0xcc   :  { %439 = vmatpush.msra.mxu3 %v681_v3  ;;  %525 = vmatpush.msrb.mxu1 %v1177_v5 }
  0xcd   :  { %322 = vrot.lane.b32.xlu0 %v308_v6, %s753_s1  ;;  %v321_v10 = vadd.f32 %v320_v9, %v319_v8  ;;  %v400_v8 = vld [vmem:[%s1336_s2 + $0x28] sm:$0xff]  ;;  %v1188_v9 = vld [vmem:[%s1336_s2 + $0x120] sm:$0xff] }
  0xce   :  { %467 = vmatpush.msrb.mxu0 %v400_v8  ;;  %719 = vmatpush.msrb.mxu2 %v400_v8 }
  0xcf   :  { %526 = vmatpush.msrb.mxu1 %v1188_v9 }
  0xd5   :  { %325 = vrot.lane.b32.xlu0 %v321_v10, %s753_s1 }
 0x13f   :  { %v323_v11 = vpop.permute.xlu0 %322 }
 0x140   :  { %v324_v12 = vadd.f32 %v323_v11, %v308_v6  ;;  %v680_v6 = vld [vmem:[%s1336_s2 + $0x98] sm:$0xff]  ;;  %v399_v11 = vld [vmem:[%s1336_s2 + $0x20] sm:$0xff] }
 0x141   :  { %440 = vmatpush.msra.mxu3 %v680_v6  ;;  %468 = vmatpush.msrb.mxu0 %v399_v11 }
 0x142   :  { %328 = vrot.lane.b32.xlu1 %v324_v12, %s754_s12  ;;  %720 = vmatpush.msrb.mxu2 %v399_v11 }
 0x147   :  { %v326_v13 = vpop.permute.xlu0 %325 }
 0x148   :  { %v327_v14 = vadd.f32 %v326_v13, %v321_v10  ;;  %v679_v10 = vld [vmem:[%s1336_s2 + $0x90] sm:$0xff]  ;;  %v1200_v13 = vld [vmem:[%s1336_s2 + $0x118] sm:$0xff] }
 0x149   :  { %441 = vmatpush.msra.mxu3 %v679_v10  ;;  %527 = vmatpush.msrb.mxu1 %v1200_v13 }
 0x14a   :  { %331 = vrot.lane.b32.xlu1 %v327_v14, %s754_s12 }
 0x1b4   :  { %v329_v15 = vpop.permute.xlu1 %328 }
 0x1b5   :  { %v330_v16 = vadd.f32 %v329_v15, %v324_v12 }
 0x1b7   :  { %334 = vrot.lane.b32.xlu2 %v330_v16, %s755_s13 }
 0x1bc   :  { %v332_v18 = vpop.permute.xlu1 %331 }
 0x1bd   :  { %v333_v19 = vadd.f32 %v332_v18, %v327_v14  ;;  %v678_v14 = vld [vmem:[%s1336_s2 + $0x88] sm:$0xff] }
 0x1be   :  { %442 = vmatpush.msra.mxu3 %v678_v14 }
 0x1bf   :  { %337 = vrot.lane.b32.xlu2 %v333_v19, %s755_s13 }
 0x211   :  { %v335_v20 = vpop.permute.xlu2 %334 }
 0x212   :  { %v1039_v21 = vadd.f32 %v335_v20, %v330_v16  ;;  %v398_v16 = vld [vmem:[%s1336_s2 + $0x18] sm:$0xff]  ;;  %v677_v20 = vld [vmem:[%s1336_s2 + $0x80] sm:$0xff] }
 0x213   :  { %469 = vmatpush.msrb.mxu0 %v398_v16  ;;  %721 = vmatpush.msrb.mxu2 %v398_v16 }
 0x214   :  { %340 = vrot.lane.b32.xlu0 %v1039_v21, %s756_s14  ;;  %443 = vmatpush.msra.mxu3 %v677_v20 }
 0x215   :  { %470 = vmatpush.msrb.mxu0 %v397_v26  ;;  %722 = vmatpush.msrb.mxu2 %v397_v26 }
 0x216   :  { %725 = vmatpush.msrb.mxu3 %v1056_v28  ;;  %v395_v28 = vld [vmem:[%s1336_s2] sm:$0xff] }
 0x217   :  { %471 = vmatpush.msrb.mxu0 %v396_v29  ;;  %723 = vmatpush.msrb.mxu2 %v396_v29 }
 0x218   :  { %726 = vmatpush.msrb.mxu3 %v1068_v31 }
 0x219   :  { %v338_v24 = vpop.permute.xlu2 %337  ;;  %472 = vmatpush.msrb.mxu0 %v395_v28  ;;  %724 = vmatpush.msrb.mxu2 %v395_v28 }
 0x21a   :  { %v1043_v25 = vadd.f32 %v338_v24, %v333_v19  ;;  %v1213_v19 = vld [vmem:[%s1336_s2 + $0x110] sm:$0xff]  ;;  %727 = vmatpush.msrb.mxu3 %v1080_v34 }
 0x21b   :  { %528 = vmatpush.msrb.mxu1 %v1213_v19 }
 0x21c   :  { %343 = vrot.lane.b32.xlu1 %v1043_v25, %s756_s14  ;;  %728 = vmatpush.msrb.mxu3 %v1092_v38  ;;  %v298_v38 = vld [vmem:[%s1337_s3] sm:$0x1] }
 0x21d   :  { %529 = vmatpush.msrb.mxu1 %v694_v27 }
 0x21e   :  { %729 = vmatpush.msrb.mxu3 %v1104_v46 }
 0x21f   :  { %530 = vmatpush.msrb.mxu1 %v693_v30 }
 0x220   :  { %730 = vmatpush.msrb.mxu3 %v1116_v49 }
 0x222   :  { %731 = vmatpush.msrb.mxu3 %v1128_v52 }
 0x224   :  { %732 = vmatpush.msrb.mxu3 %v1140_v56 }
 0x226   :  { %733 = vmatpush.msrb.mxu3 %v1152_v62 }
 0x228   :  { %734 = vmatpush.msrb.mxu3 %v1164_v1 }
 0x22a   :  { %735 = vmatpush.msrb.mxu3 %v1177_v5 }
 0x22c   :  { %736 = vmatpush.msrb.mxu3 %v1188_v9 }
 0x22e   :  { %737 = vmatpush.msrb.mxu3 %v1200_v13 }
 0x230   :  { %738 = vmatpush.msrb.mxu3 %v1213_v19 }
 0x232   :  { %739 = vmatpush.msrb.mxu3 %v694_v27 }
 0x234   :  { %740 = vmatpush.msrb.mxu3 %v693_v30 }
 0x286   :  { %v341_v59 = vpop.permute.xlu0 %340 }
 0x287   :  { %v342_v2 = vadd.f32 %v341_v59, %v1039_v21 }
 0x289   :  { %v346_v12 = vmul.f32 0.001953125, %v342_v2 }
 0x28b   :  { %v348_v21 = vmul.f32 %v346_v12, %v346_v12  ;;  %v361_v34 = vperm.slane %v346_v12, 0 }
 0x28d   :  { %v363_v48 = vsub.f32 %v1013_v40, %v361_v34  ;;  %v364_v49 = vsub.f32 %v1017_v43, %v361_v34  ;;  %v365_v50 = vsub.f32 %v1028_v55, %v361_v34  ;;  %v362_v52 = vsub.f32 %v1015_v41, %v361_v34 }
 0x28e   :  { %v344_v15 = vpop.permute.xlu1 %343 }
 0x28f   :  { %v345_v18 = vadd.f32 %v344_v15, %v1043_v25 }
 0x291   :  { %v347_v24 = vmul.f32 0.001953125, %v345_v18 }
 0x293   :  { %v349_v25 = vsub.f32 %v347_v24, %v348_v21 }
 0x295   :  { %v350_v32 = vadd.f32 1e-05, %v349_v25 }
 0x297   :  { %748 = vrsqrt.f32 %v350_v32  ;;  %vm357_vm7 = vweird.f32 %v350_v32 }
 0x29d   :  { %v749_v33 = vpop.eup %748 }
 0x29e   :  { %v352_v31 = vmul.f32 %v749_v33, %v350_v32  ;;  %vm358_vm6 = vweird.f32 %v749_v33 }
 0x29f   :  { %vm359_vm8 = vmor %vm357_vm7, %vm358_vm6 }
 0x2a0   :  { %v353_v35 = vmul.f32 %v749_v33, %v352_v31 }
 0x2a2   :  { %v354_v36 = vmul.f32 0.5, %v353_v35 }
 0x2a4   :  { %v355_v39 = vsub.f32 1.5, %v354_v36 }
 0x2a6   :  { %v356_v44 = vmul.f32 %v749_v33, %v355_v39 }
 0x2a8   :  { %v360_v46 = vsel %vm359_vm8, %v749_v33, %v356_v44 }
 0x2a9   :  { %v366_v47 = vmul.f32 %v360_v46, %v298_v38 }
 0x2ab   :  { %v367_v51 = vperm.slane %v366_v47, 0 }
 0x2ad   :  { %v368_v54 = vmul.f32 %v367_v51, %v362_v52  ;;  %v369_v56 = vmul.f32 %v367_v51, %v363_v48  ;;  %v371_v57 = vmul.f32 %v367_v51, %v365_v50  ;;  %v370_v59 = vmul.f32 %v367_v51, %v364_v49 }
 0x2af   :  { %v375_v40 = vadd.f32 %v746_v53, %v368_v54  ;;  %v376_v61 = vadd.f32 %v746_v53, %v369_v56  ;;  %v378_v43 = vadd.f32 %v746_v53, %v371_v57  ;;  %v377_v62 = vadd.f32 %v746_v53, %v370_v59 }
 0x2b1   :  { %v379_v55 = vmax.f32 %v375_v40, 0.0  ;;  %v380_v63 = vmax.f32 %v376_v61, 0.0  ;;  %v382_v41 = vmax.f32 %v378_v43, 0.0  ;;  %v381_v0 = vmax.f32 %v377_v62, 0.0 }
 0x2b3   :  { %v383_v1 = vrot.slane %v379_v55, 7  ;;  %444 = vmatmul.f32.vlgmr.msra.gmra.mxu3 %v379_v55  ;;  %v486_v2 = vrot.slane %v379_v55, 1  ;;  %v487_v3 = vrot.slane %v380_v63, 1  ;;  %v386_v4 = vrot.slane %v382_v41, 7 }
 0x2b4   :  { %v384_v5 = vrot.slane %v380_v63, 7  ;;  %v385_v6 = vrot.slane %v381_v0, 7  ;;  %v488_v10 = vrot.slane %v381_v0, 1 }
 0x2b5   :  { %v492_v8 = vsel %vm239_vm2, %v486_v2, %v487_v3  ;;  %v390_v9 = vsel %vm135_vm1, %v386_v4, %v383_v1 }
 0x2b6   :  { %531 = vmatmul.f32.vlgmr.msrb.gmra.mxu1 %v492_v8  ;;  %v391_v11 = vmul.f32 %v954_v58, %v390_v9  ;;  %v388_v12 = vsel %vm135_vm1, %v384_v5, %v385_v6  ;;  %v491_v14 = vsel %vm239_vm2, %v487_v3, %v488_v10  ;;  %v389_v16 = vsel %vm135_vm1, %v383_v1, %v384_v5 }
 0x2b7   :  { %v393_v13 = vmul.f32 %v995_v17, %v388_v12  ;;  %v495_v15 = vmul.f32 %v983_v7, %v491_v14  ;;  %v387_v58 = vsel %vm135_vm1, %v385_v6, %v386_v4  ;;  %v489_v17 = vrot.slane %v382_v41, 1 }
 0x2b8   :  { %473 = vmatmul.f32.vlgmr.msrb.gmra.mxu0 %v391_v11 }
 0x2b9   :  { %479 = vmatmul.f32.vlgmr.msrb.gmra.mxu2 %v393_v13  ;;  %v490_v18 = vsel %vm239_vm2, %v488_v10, %v489_v17  ;;  %v493_v19 = vsel %vm239_vm2, %v489_v17, %v486_v2 }
 0x2ba   :  { %v497_v7 = vmul.f32 %v1003_v23, %v493_v19 }
 0x2bb   :  { %447 = vmatmul.f32.gmra.mxu3 %v380_v63 }
 0x2be   :  { %534 = vmatmul.f32.gmra.mxu1 %v495_v15 }
 0x2c0   :  { %476 = vmatmul.f32.gmra.mxu0 %v389_v16 }
 0x2c1   :  { %482 = vmatmul.f32.gmra.mxu2 %v387_v58 }
 0x2c3   :  { %450 = vmatmul.f32.gmra.mxu3 %v381_v0 }
 0x2cb   :  { %453 = vmatmul.f32.gmra.mxu3 %v382_v41 }
 0x2d3   :  { %537 = vmatmul.f32.vlgmr.msrb.gmra.mxu3 %v490_v18 }
 0x2db   :  { %540 = vmatmul.f32.gmra.mxu3 %v497_v7 }
 0x333   :  { %v532_v26 = vpop.f32.mrf.mxu1 }
 0x335   :  { %v474_v24 = vpop.f32.mrf.mxu0 }
 0x336   :  { %v445_v20 = vpop.f32.mrf.mxu3 }
 0x337   :  { %v475_v28 = vadd.f32 %v474_v24, %v445_v20 }
 0x339   :  { %v1281_v22 = vadd.f32 %v532_v26, %v475_v28  ;;  %v548_v28 = vld [vmem:[%s1339_s5] sm:$0x1] }
 0x33b   :  { %v535_v33 = vpop.f32.mrf.mxu1  ;;  %v559_v38 = vmul.f32 %v1281_v22, %v1281_v22 }
 0x33c   :  { %v480_v30 = vpop.f32.mrf.mxu2 }
 0x33d   :  { %v477_v29 = vpop.f32.mrf.mxu0 }
 0x33e   :  { %v448_v21 = vpop.f32.mrf.mxu3 }
 0x33f   :  { %v478_v32 = vadd.f32 %v477_v29, %v448_v21 }
 0x341   :  { %v1279_v35 = vadd.f32 %v535_v33, %v478_v32 }
 0x343   :  { %v560_v23 = vmul.f32 %v1279_v35, %v1279_v35  ;;  %v550_v46 = vadd.f32 %v1279_v35, %v1281_v22 }
 0x344   :  { %v483_v34 = vpop.f32.mrf.mxu2 }
 0x345   :  { %v563_v50 = vadd.f32 %v560_v23, %v559_v38 }
 0x346   :  { %v451_v25 = vpop.f32.mrf.mxu3 }
 0x347   :  { %v481_v36 = vadd.f32 %v480_v30, %v451_v25 }
 0x34e   :  { %v454_v27 = vpop.f32.mrf.mxu3 }
 0x34f   :  { %v484_v44 = vadd.f32 %v483_v34, %v454_v27 }
 0x356   :  { %v538_v31 = vpop.f32.mrf.mxu3 }
 0x357   :  { %v1283_v39 = vadd.f32 %v538_v31, %v481_v36 }
 0x359   :  { %v561_v47 = vmul.f32 %v1283_v39, %v1283_v39  ;;  %v551_v49 = vadd.f32 %v550_v46, %v1283_v39  ;;  %v747_v46 = vld [vmem:[%s1338_s6] ss:$0 sm:$0xff] }
 0x35b   :  { %v564_v52 = vadd.f32 %v563_v50, %v561_v47 }
 0x35e   :  { %v541_v48 = vpop.f32.mrf.mxu3 }
 0x35f   :  { %v1294_v51 = vadd.f32 %v541_v48, %v484_v44 }
 0x361   :  { %v552_v53 = vadd.f32 %v551_v49, %v1294_v51  ;;  %v562_v54 = vmul.f32 %v1294_v51, %v1294_v51 }
 0x363   :  { %v553_v56 = vrot.slane %v552_v53, 4  ;;  %v565_v57 = vadd.f32 %v564_v52, %v562_v54 }
 0x365   :  { %v554_v59 = vadd.f32 %v553_v56, %v552_v53  ;;  %v566_v40 = vrot.slane %v565_v57, 4 }
 0x367   :  { %v555_v61 = vrot.slane %v554_v59, 2  ;;  %v567_v43 = vadd.f32 %v566_v40, %v565_v57 }
 0x369   :  { %v556_v62 = vadd.f32 %v555_v61, %v554_v59  ;;  %v568_v55 = vrot.slane %v567_v43, 2 }
 0x36b   :  { %v557_v63 = vrot.slane %v556_v62, 1  ;;  %v569_v41 = vadd.f32 %v568_v55, %v567_v43 }
 0x36d   :  { %v558_v0 = vadd.f32 %v557_v63, %v556_v62  ;;  %v570_v1 = vrot.slane %v569_v41, 1 }
 0x36f   :  { %572 = vrot.lane.b32.xlu2 %v558_v0, %s753_s1  ;;  %v571_v2 = vadd.f32 %v570_v1, %v569_v41 }
 0x371   :  { %575 = vrot.lane.b32.xlu0 %v571_v2, %s753_s1 }
 0x3c9   :  { %v573_v3 = vpop.permute.xlu2 %572 }
 0x3ca   :  { %v574_v4 = vadd.f32 %v573_v3, %v558_v0 }
 0x3cc   :  { %578 = vrot.lane.b32.xlu1 %v574_v4, %s754_s12 }
 0x3e3   :  { %v576_v5 = vpop.permute.xlu0 %575 }
 0x3e4   :  { %v577_v6 = vadd.f32 %v576_v5, %v571_v2 }
 0x3e6   :  { %581 = vrot.lane.b32.xlu2 %v577_v6, %s754_s12 }
 0x43e   :  { %v579_v8 = vpop.permute.xlu1 %578 }
 0x43f   :  { %v580_v9 = vadd.f32 %v579_v8, %v574_v4 }
 0x440   :  { %v582_v10 = vpop.permute.xlu2 %581 }
 0x441   :  { %v583_v11 = vadd.f32 %v582_v10, %v577_v6  ;;  %584 = vrot.lane.b32.xlu0 %v580_v9, %s755_s13 }
 0x443   :  { %587 = vrot.lane.b32.xlu1 %v583_v11, %s755_s13 }
 0x4b3   :  { %v585_v12 = vpop.permute.xlu0 %584 }
 0x4b4   :  { %v586_v13 = vadd.f32 %v585_v12, %v580_v9 }
 0x4b5   :  { %v588_v14 = vpop.permute.xlu1 %587 }
 0x4b6   :  { %v589_v15 = vadd.f32 %v588_v14, %v583_v11  ;;  %590 = vrot.lane.b32.xlu2 %v586_v13, %s756_s14 }
 0x4b8   :  { %593 = vrot.lane.b32.xlu0 %v589_v15, %s756_s14 }
 0x510   :  { %v591_v16 = vpop.permute.xlu2 %590 }
 0x511   :  { %v592_v58 = vadd.f32 %v591_v16, %v586_v13 }
 0x513   :  { %v596_v17 = vmul.f32 0.001953125, %v592_v58 }
 0x515   :  { %v598_v7 = vmul.f32 %v596_v17, %v596_v17  ;;  %v611_v32 = vperm.slane %v596_v17, 0 }
 0x517   :  { %v612_v23 = vsub.f32 %v1281_v22, %v611_v32  ;;  %v613_v34 = vsub.f32 %v1279_v35, %v611_v32  ;;  %v614_v38 = vsub.f32 %v1283_v39, %v611_v32  ;;  %v615_v44 = vsub.f32 %v1294_v51, %v611_v32 }
 0x52a   :  { %v594_v18 = vpop.permute.xlu0 %593 }
 0x52b   :  { %v595_v19 = vadd.f32 %v594_v18, %v589_v15 }
 0x52d   :  { %v597_v20 = vmul.f32 0.001953125, %v595_v19 }
 0x52f   :  { %v599_v21 = vsub.f32 %v597_v20, %v598_v7 }
 0x531   :  { %v600_v24 = vadd.f32 1e-05, %v599_v21 }
 0x533   :  { %750 = vrsqrt.f32 %v600_v24  ;;  %vm607_vm10 = vweird.f32 %v600_v24 }
 0x539   :  { %v751_v25 = vpop.eup %750 }
 0x53a   :  { %v602_v26 = vmul.f32 %v751_v25, %v600_v24  ;;  %vm608_vm9 = vweird.f32 %v751_v25 }
 0x53b   :  { %vm609_vm11 = vmor %vm607_vm10, %vm608_vm9 }
 0x53c   :  { %v603_v27 = vmul.f32 %v751_v25, %v602_v26 }
 0x53e   :  { %v604_v29 = vmul.f32 0.5, %v603_v27 }
 0x540   :  { %v605_v30 = vsub.f32 1.5, %v604_v29 }
 0x542   :  { %v606_v33 = vmul.f32 %v751_v25, %v605_v30 }
 0x544   :  { %v610_v31 = vsel %vm609_vm11, %v751_v25, %v606_v33 }
 0x545   :  { %v616_v36 = vmul.f32 %v610_v31, %v548_v28 }
 0x547   :  { %v617_v47 = vperm.slane %v616_v36, 0 }
 0x549   :  { %v618_v48 = vmul.f32 %v617_v47, %v612_v23  ;;  %v619_v49 = vmul.f32 %v617_v47, %v613_v34  ;;  %v620_v50 = vmul.f32 %v617_v47, %v614_v38  ;;  %v621_v52 = vmul.f32 %v617_v47, %v615_v44 }
 0x54b   :  { %v625_v53 = vadd.f32 %v747_v46, %v618_v48  ;;  %v626_v54 = vadd.f32 %v747_v46, %v619_v49  ;;  %v627_v56 = vadd.f32 %v747_v46, %v620_v50  ;;  %v628_v57 = vadd.f32 %v747_v46, %v621_v52 }
 0x54d   :  { %v629_v22 = vadd.f32 %v625_v53, %v917_v42  ;;  %v630_v35 = vadd.f32 %v626_v54, %v928_v45  ;;  %v631_v39 = vadd.f32 %v627_v56, %v963_v60  ;;  %v632_v51 = vadd.f32 %v628_v57, %v903_v37 }
 0x54f   :  { %633 = vst [vmem:[%s1340_s7] sm:$0xff] %v629_v22 }
 0x550   :  { %634 = vst [vmem:[%s1340_s7 + $0x8] sm:$0xff] %v630_v35 }
 0x551   :  { %635 = vst [vmem:[%s1340_s7 + $0x10] sm:$0xff] %v631_v39 }
 0x552   :  { %636 = vst [vmem:[%s1340_s7 + $0x18] sm:$0xff] %v632_v51 }

</bundles_post_ra>
